<compile_context>
chip_gen: v7x
topology: tpu7x:2x2x1
jax: 0.10.0
libtpu: 0.0.40
codegen_flags: <defaults>
</compile_context>

<pallas_src>
import functools

import jax
import jax.numpy as jnp
import numpy as np
from jax.experimental import pallas as pl
from jax.experimental.pallas import tpu as pltpu

EPS = 1e-5


# ---------------------------------------------------------------------------
# Pass 1: direct 3x3 conv on the padded flat layout + masked per-tile BN stats
# ---------------------------------------------------------------------------
def _conv_stats_kernel(w_ref, xm_ref, xc_ref, xp_ref, mask_ref,
                       pre_ref, stats_ref, *, offsets, tile_m):
    # Halo window over the flat spatial axis: [m0 - T, m0 + 2T) columns.
    window = jnp.concatenate([xm_ref[...], xc_ref[...], xp_ref[...]], axis=1)

    # 3x3 conv as 9 accumulated matmuls: (3C, Cin) @ (Cin, TILE_M) on the MXU.
    # Tap k reads the window shifted by its static flat offset d_k.
    acc = jnp.zeros(pre_ref.shape, jnp.float32)
    for k, d in enumerate(offsets):
        acc = acc + jnp.dot(w_ref[k],
                            window[:, tile_m + d: 2 * tile_m + d],
                            preferred_element_type=jnp.float32)
    pre_ref[...] = acc

    # Per-tile, per-channel sum / sum-of-squares for the two-pass BatchNorm.
    # The mask zeroes the conv-padding columns of the flat layout so the batch
    # statistics are taken over exactly the B*H*W real pixels.
    pm = acc * mask_ref[...]
    stats_ref[0, :, 0:1] = jnp.sum(pm, axis=1, keepdims=True)
    stats_ref[0, :, 1:2] = jnp.sum(pm * acc, axis=1, keepdims=True)


def conv_and_stats(w9, xpf, mask, tile_m, offsets):
    """w9: (9, Cg, Cin), xpf: (Cin, Mp), mask: (1, Mp) ->
       pre: (Cg, Mp) f32, stats: (num_tiles, Cg, 2) f32."""
    _, Cg, Cin = w9.shape
    Mp = xpf.shape[1]
    num_tiles = Mp // tile_m
    kernel = functools.partial(_conv_stats_kernel,
                               offsets=tuple(offsets), tile_m=tile_m)
    return pl.pallas_call(
        kernel,
        out_shape=(
            jax.ShapeDtypeStruct((Cg, Mp), jnp.float32),
            jax.ShapeDtypeStruct((num_tiles, Cg, 2), jnp.float32),
        ),
        grid=(num_tiles,),
        in_specs=[
            pl.BlockSpec((9, Cg, Cin), lambda i: (0, 0, 0)),   # weights: resident
            # Current tile plus clamped left/right neighbours (halo).  Clamping
            # only ever affects columns that are conv padding (masked/discarded).
            pl.BlockSpec((Cin, tile_m), lambda i: (0, jnp.maximum(i - 1, 0))),
            pl.BlockSpec((Cin, tile_m), lambda i: (0, i)),
            pl.BlockSpec((Cin, tile_m),
                         lambda i: (0, jnp.minimum(i + 1, num_tiles - 1))),
            pl.BlockSpec((1, tile_m), lambda i: (0, i)),       # interior mask
        ],
        out_specs=(
            pl.BlockSpec((Cg, tile_m), lambda i: (0, i)),      # lane-dense
            pl.BlockSpec((1, Cg, 2), lambda i: (i, 0, 0)),
        ),
        compiler_params=pltpu.CompilerParams(
            dimension_semantics=("parallel",)),
    )(w9, xpf, xpf, xpf, mask)


# ---------------------------------------------------------------------------
# Pass 2: fused BatchNorm (precomputed scale/shift) + ReLU + h2h bias + gates
# ---------------------------------------------------------------------------
def _bn_gates_kernel(scale_ref, shift_ref, bh_ref, pre_ref, h_ref):
    C = h_ref.shape[0]                                   # Cout
    # BN (training-mode stats folded into scale/shift) + ReLU.
    y = jnp.maximum(pre_ref[...] * scale_ref[...] + shift_ref[...], 0.0)
    # conv_h2h(prev_h == 0) reduces to its bias.
    t = y + bh_ref[...]
    # Channel rows are ordered [i | o | g] (f-gate dropped: prev_c == 0).
    i_g = jax.nn.sigmoid(t[0 * C:1 * C, :])
    o_g = jax.nn.sigmoid(t[1 * C:2 * C, :])
    g_g = jnp.tanh(t[2 * C:3 * C, :])
    c = i_g * g_g                                        # f*prev_c term == 0
    h_ref[...] = o_g * jnp.tanh(c)


def bn_relu_gates(pre, scale, shift, b_h2h, cout, tile_m):
    Cg, Mp = pre.shape
    num_tiles = Mp // tile_m
    return pl.pallas_call(
        _bn_gates_kernel,
        out_shape=jax.ShapeDtypeStruct((cout, Mp), jnp.float32),
        grid=(num_tiles,),
        in_specs=[
            pl.BlockSpec((Cg, 1), lambda i: (0, 0)),       # per-channel params
            pl.BlockSpec((Cg, 1), lambda i: (0, 0)),       #   (resident, DMA'd
            pl.BlockSpec((Cg, 1), lambda i: (0, 0)),       #    once)
            pl.BlockSpec((Cg, tile_m), lambda i: (0, i)),  # pre-activation tiles
        ],
        out_specs=pl.BlockSpec((cout, tile_m), lambda i: (0, i)),  # lane-dense
        compiler_params=pltpu.CompilerParams(
            dimension_semantics=("parallel",)),
    )(scale, shift, b_h2h, pre)


# ---------------------------------------------------------------------------
# JAX glue: padded flat layout, interior mask, parameter plumbing
# ---------------------------------------------------------------------------
def _pick_tile_m(Mp, W):
    # Halo (W+3 columns) must fit inside one tile; ~512 lanes reaches ~85% of
    # the HBM roofline on v6e.  On v7x (64 MiB VMEM) this still fits trivially.
    min_t = 128 * pl.cdiv(W + 3, 128)
    return max(min_t, min(512, 128 * pl.cdiv(Mp, 128)))


def convrnn_forward(x_nchw, params, tile_m=None):
    """ConvRNN(cell='lstm').forward on a fresh module (prev_h = prev_c = 0)."""
    B, Cin, H, W = x_nchw.shape
    Cout = params["w_x2h"].shape[0] // 4
    Hp, Wp = H + 2, W + 2
    M = B * H * W                      # real pixels (BN statistic count)
    Mp = B * Hp * Wp                   # padded flat length
    if tile_m is None:
        tile_m = _pick_tile_m(Mp, W)
    assert tile_m % 128 == 0 and tile_m >= W + 3, (tile_m, W)
    num_tiles = pl.cdiv(Mp, tile_m)
    Mp_pad = num_tiles * tile_m

    # Channels that actually matter: gates i, o, g (f-gate is dead: prev_c==0).
    keep = np.concatenate([np.arange(0, Cout), np.arange(2 * Cout, 4 * Cout)])

    # Conv weight reordered to (tap, out_channel, in_channel) so the kernel can
    # index taps on the leading axis:  w9[kh*3+kw] = W[keep, :, kh, kw].
    wk = params["w_x2h"][keep]                                   # (3C, Cin, 3, 3)
    w9 = jnp.transpose(wk, (2, 3, 0, 1)).reshape(9, 3 * Cout, Cin)
    gamma = params["bn_gamma"][keep]
    beta = params["bn_beta"][keep]
    b_h2h = params["b_h2h"][keep]
    # b_x2h is intentionally dropped: a per-channel constant bias cancels
    # inside training-mode BatchNorm (it is removed with the batch mean).

    # Padded, channel-major flat layout: column m <-> (b, hp, wp).
    xp = jnp.pad(x_nchw, ((0, 0), (0, 0), (1, 1), (1, 1)))       # (B,Cin,Hp,Wp)
    xpf = jnp.transpose(xp, (1, 0, 2, 3)).reshape(Cin, Mp)
    xpf = jnp.pad(xpf, ((0, 0), (0, Mp_pad - Mp))).astype(jnp.float32)

    # Static interior mask: 1.0 on real pixels, 0.0 on conv padding / tail pad.
    m_idx = np.arange(Mp)
    hp_i = (m_idx // Wp) % Hp
    wp_i = m_idx % Wp
    interior = ((hp_i >= 1) & (hp_i <= H) & (wp_i >= 1) & (wp_i <= W))
    mask = jnp.asarray(
        np.pad(interior.astype(np.float32), (0, Mp_pad - Mp)).reshape(1, Mp_pad))

    # Flat offset of tap (kh, kw) relative to the output pixel.
    offsets = [(kh - 1) * Wp + (kw - 1) for kh in range(3) for kw in range(3)]

    # ---- Pass 1: in-kernel conv + masked per-tile BN statistics -------------
    pre, stats = conv_and_stats(w9, xpf, mask, tile_m, offsets)

    # ---- Reduce stats -> BN batch statistics (biased variance) --------------
    st = stats.sum(axis=0)                                       # (3C, 2)
    mean = st[:, 0] / M
    var = st[:, 1] / M - mean * mean        # fine at f32 for BN-scale data
    rstd = jax.lax.rsqrt(var + EPS)
    scale = (gamma * rstd).reshape(-1, 1)
    shift = (beta - mean * gamma * rstd).reshape(-1, 1)

    # ---- Pass 2: fused BN + ReLU + h2h-bias + LSTM gates ---------------------
    h_pad = bn_relu_gates(pre, scale, shift, b_h2h.reshape(-1, 1),
                          Cout, tile_m)                          # (Cout, Mp_pad)

    # Extract the interior pixels and return NCHW.
    h = h_pad[:, :Mp].reshape(Cout, B, Hp, Wp)[:, :, 1:H + 1, 1:W + 1]
    return jnp.transpose(h, (1, 0, 2, 3))                        # (B, Cout, H, W)


# ---------------------------------------------------------------------------
# Pure-JAX reference (full fidelity: bias, f-gate, h2h conv with zero state)
# ---------------------------------------------------------------------------
def reference_forward(x, params):
    Cout = params["w_x2h"].shape[0] // 4
    dn = ("NCHW", "OIHW", "NCHW")
    conv = lambda v, w: jax.lax.conv_general_dilated(
        v, w, (1, 1), ((1, 1), (1, 1)), dimension_numbers=dn,
        precision=jax.lax.Precision.HIGHEST)
    pre = conv(x, params["w_x2h"]) + params["b_x2h"][None, :, None, None]
    mean = pre.mean(axis=(0, 2, 3), keepdims=True)
    var = ((pre - mean) ** 2).mean(axis=(0, 2, 3), keepdims=True)
    y = (pre - mean) / jnp.sqrt(var + EPS)
    y = y * params["bn_gamma"][None, :, None, None] + params["bn_beta"][None, :, None, None]
    y = jnp.maximum(y, 0.0)
    B, _, H, W = x.shape
    prev_h = jnp.zeros((B, Cout, H, W), jnp.float32)
    prev_c = jnp.zeros((B, Cout, H, W), jnp.float32)
    tmp = conv(prev_h, params["w_h2h"]) + params["b_h2h"][None, :, None, None] + y
    cc_i, cc_f, cc_o, cc_g = jnp.split(tmp, 4, axis=1)
    i = jax.nn.sigmoid(cc_i)
    f = jax.nn.sigmoid(cc_f)
    o = jax.nn.sigmoid(cc_o)
    g = jnp.tanh(cc_g)
    c = f * prev_c + i * g
    return o * jnp.tanh(c)


# ---------------------------------------------------------------------------
if __name__ == "__main__":
    B, Cin, Cout, H, W = 2, 4, 8, 16, 16

    key = jax.random.PRNGKey(0)
    ks = jax.random.split(key, 7)
    params = {
        # conv_x2h: Conv2d(Cin, 4*Cout, 3, padding=1)
        "w_x2h": 0.1 * jax.random.normal(ks[0], (4 * Cout, Cin, 3, 3), jnp.float32),
        "b_x2h": 0.1 * jax.random.normal(ks[1], (4 * Cout,), jnp.float32),
        # BatchNorm2d(4*Cout)
        "bn_gamma": 1.0 + 0.1 * jax.random.normal(ks[2], (4 * Cout,), jnp.float32),
        "bn_beta": 0.1 * jax.random.normal(ks[3], (4 * Cout,), jnp.float32),
        # ConvLSTMCell.conv_h2h: Conv2d(Cout, 4*Cout, 3, padding=1)
        "w_h2h": 0.1 * jax.random.normal(ks[4], (4 * Cout, Cout, 3, 3), jnp.float32),
        "b_h2h": 0.1 * jax.random.normal(ks[5], (4 * Cout,), jnp.float32),
    }
    x = jax.random.normal(ks[6], (B, Cin, H, W), jnp.float32)

    # tile_m=128 forces a 6-step grid so the halo reads (clamped neighbour
    # tiles), pipeline and per-tile BN-stats reduction are actually exercised
    # (padded flat length = 2*18*18 = 648 -> 768 after tail padding).
    fwd = jax.jit(functools.partial(convrnn_forward, tile_m=128))
    h = jax.block_until_ready(fwd(x, params))
    assert h.shape == (B, Cout, H, W), h.shape

    h_ref = jax.block_until_ready(reference_forward(x, params))
    np.testing.assert_allclose(np.asarray(h), np.asarray(h_ref),
                               rtol=1e-2, atol=1e-2)

    print("KERNEL_OK")
</pallas_src>

<mosaic_0001>
module attributes {stable_mosaic.version = 11 : i64} {
  func.func @_conv_stats_kernel(%arg0: i32, %arg1: memref<9x24x4xf32, #tpu.memory_space<vmem>>, %arg2: memref<4x128xf32, #tpu.memory_space<vmem>>, %arg3: memref<4x128xf32, #tpu.memory_space<vmem>>, %arg4: memref<4x128xf32, #tpu.memory_space<vmem>>, %arg5: memref<1x128xf32, #tpu.memory_space<vmem>>, %arg6: memref<24x128xf32, #tpu.memory_space<vmem>>, %arg7: memref<1x24x2xf32, #tpu.memory_space<vmem>>) attributes {dimension_semantics = [#tpu.dimension_semantics<parallel>], iteration_bounds = array<i64: 6>, scalar_prefetch = 0 : i64, scratch_operands = 0 : i64, tpu.core_type = #tpu.core_type<tc>, window_params = [{pipeline_mode = #tpu.pipeline_mode<synchronous>, transform_indices = @transform_0, window_bounds = array<i64: 9, 24, 4>}, {transform_indices = @transform_1, window_bounds = array<i64: 4, 128>}, {transform_indices = @transform_2, window_bounds = array<i64: 4, 128>}, {transform_indices = @transform_3, window_bounds = array<i64: 4, 128>}, {transform_indices = @transform_4, window_bounds = array<i64: 1, 128>}, {transform_indices = @transform_5, window_bounds = array<i64: 24, 128>}, {transform_indices = @transform_6, window_bounds = array<i64: 1, 24, 2>}]} {
    %c0 = arith.constant 0 : index
    %c0_0 = arith.constant 0 : index
    %0 = vector.load %arg2[%c0, %c0_0] : memref<4x128xf32, #tpu.memory_space<vmem>>, vector<4x128xf32>
    %c0_1 = arith.constant 0 : index
    %c0_2 = arith.constant 0 : index
    %1 = vector.load %arg3[%c0_1, %c0_2] : memref<4x128xf32, #tpu.memory_space<vmem>>, vector<4x128xf32>
    %c0_3 = arith.constant 0 : index
    %c0_4 = arith.constant 0 : index
    %2 = vector.load %arg4[%c0_3, %c0_4] : memref<4x128xf32, #tpu.memory_space<vmem>>, vector<4x128xf32>
    %3 = tpu.concatenate %0, %1, %2 in 1 : vector<4x128xf32>, vector<4x128xf32>, vector<4x128xf32> -> vector<4x384xf32>
    %cst = arith.constant 0.000000e+00 : f32
    %4 = vector.broadcast %cst : f32 to vector<24x128xf32>
    %c0_5 = arith.constant 0 : index
    %c0_6 = arith.constant 0 : index
    %c0_7 = arith.constant 0 : index
    %5 = vector.load %arg1[%c0_5, %c0_6, %c0_7] : memref<9x24x4xf32, #tpu.memory_space<vmem>>, vector<1x24x4xf32>
    %6 = vector.shape_cast %5 : vector<1x24x4xf32> to vector<24x4xf32>
    %7 = vector.extract_strided_slice %3 {offsets = [0, 109], sizes = [4, 128], strides = [1, 1]} : vector<4x384xf32> to vector<4x128xf32>
    %cst_8 = arith.constant dense<0.000000e+00> : vector<24x128xf32>
    %8 = tpu.matmul %6, %7, %cst_8 {dimension_numbers = #tpu.dot_dimension_numbers<[1], [0], [0], [1], [0, 0, 1, 1], [], []>} : vector<24x4xf32>, vector<4x128xf32>, vector<24x128xf32> -> vector<24x128xf32>
    %9 = arith.addf %4, %8 : vector<24x128xf32>
    %c1 = arith.constant 1 : index
    %c0_9 = arith.constant 0 : index
    %c0_10 = arith.constant 0 : index
    %10 = vector.load %arg1[%c1, %c0_9, %c0_10] : memref<9x24x4xf32, #tpu.memory_space<vmem>>, vector<1x24x4xf32>
    %11 = vector.shape_cast %10 : vector<1x24x4xf32> to vector<24x4xf32>
    %12 = vector.extract_strided_slice %3 {offsets = [0, 110], sizes = [4, 128], strides = [1, 1]} : vector<4x384xf32> to vector<4x128xf32>
    %cst_11 = arith.constant dense<0.000000e+00> : vector<24x128xf32>
    %13 = tpu.matmul %11, %12, %cst_11 {dimension_numbers = #tpu.dot_dimension_numbers<[1], [0], [0], [1], [0, 0, 1, 1], [], []>} : vector<24x4xf32>, vector<4x128xf32>, vector<24x128xf32> -> vector<24x128xf32>
    %14 = arith.addf %9, %13 : vector<24x128xf32>
    %c2 = arith.constant 2 : index
    %c0_12 = arith.constant 0 : index
    %c0_13 = arith.constant 0 : index
    %15 = vector.load %arg1[%c2, %c0_12, %c0_13] : memref<9x24x4xf32, #tpu.memory_space<vmem>>, vector<1x24x4xf32>
    %16 = vector.shape_cast %15 : vector<1x24x4xf32> to vector<24x4xf32>
    %17 = vector.extract_strided_slice %3 {offsets = [0, 111], sizes = [4, 128], strides = [1, 1]} : vector<4x384xf32> to vector<4x128xf32>
    %cst_14 = arith.constant dense<0.000000e+00> : vector<24x128xf32>
    %18 = tpu.matmul %16, %17, %cst_14 {dimension_numbers = #tpu.dot_dimension_numbers<[1], [0], [0], [1], [0, 0, 1, 1], [], []>} : vector<24x4xf32>, vector<4x128xf32>, vector<24x128xf32> -> vector<24x128xf32>
    %19 = arith.addf %14, %18 : vector<24x128xf32>
    %c3 = arith.constant 3 : index
    %c0_15 = arith.constant 0 : index
    %c0_16 = arith.constant 0 : index
    %20 = vector.load %arg1[%c3, %c0_15, %c0_16] : memref<9x24x4xf32, #tpu.memory_space<vmem>>, vector<1x24x4xf32>
    %21 = vector.shape_cast %20 : vector<1x24x4xf32> to vector<24x4xf32>
    %22 = vector.extract_strided_slice %3 {offsets = [0, 127], sizes = [4, 128], strides = [1, 1]} : vector<4x384xf32> to vector<4x128xf32>
    %cst_17 = arith.constant dense<0.000000e+00> : vector<24x128xf32>
    %23 = tpu.matmul %21, %22, %cst_17 {dimension_numbers = #tpu.dot_dimension_numbers<[1], [0], [0], [1], [0, 0, 1, 1], [], []>} : vector<24x4xf32>, vector<4x128xf32>, vector<24x128xf32> -> vector<24x128xf32>
    %24 = arith.addf %19, %23 : vector<24x128xf32>
    %c4 = arith.constant 4 : index
    %c0_18 = arith.constant 0 : index
    %c0_19 = arith.constant 0 : index
    %25 = vector.load %arg1[%c4, %c0_18, %c0_19] : memref<9x24x4xf32, #tpu.memory_space<vmem>>, vector<1x24x4xf32>
    %26 = vector.shape_cast %25 : vector<1x24x4xf32> to vector<24x4xf32>
    %27 = vector.extract_strided_slice %3 {offsets = [0, 128], sizes = [4, 128], strides = [1, 1]} : vector<4x384xf32> to vector<4x128xf32>
    %cst_20 = arith.constant dense<0.000000e+00> : vector<24x128xf32>
    %28 = tpu.matmul %26, %27, %cst_20 {dimension_numbers = #tpu.dot_dimension_numbers<[1], [0], [0], [1], [0, 0, 1, 1], [], []>} : vector<24x4xf32>, vector<4x128xf32>, vector<24x128xf32> -> vector<24x128xf32>
    %29 = arith.addf %24, %28 : vector<24x128xf32>
    %c5 = arith.constant 5 : index
    %c0_21 = arith.constant 0 : index
    %c0_22 = arith.constant 0 : index
    %30 = vector.load %arg1[%c5, %c0_21, %c0_22] : memref<9x24x4xf32, #tpu.memory_space<vmem>>, vector<1x24x4xf32>
    %31 = vector.shape_cast %30 : vector<1x24x4xf32> to vector<24x4xf32>
    %32 = vector.extract_strided_slice %3 {offsets = [0, 129], sizes = [4, 128], strides = [1, 1]} : vector<4x384xf32> to vector<4x128xf32>
    %cst_23 = arith.constant dense<0.000000e+00> : vector<24x128xf32>
    %33 = tpu.matmul %31, %32, %cst_23 {dimension_numbers = #tpu.dot_dimension_numbers<[1], [0], [0], [1], [0, 0, 1, 1], [], []>} : vector<24x4xf32>, vector<4x128xf32>, vector<24x128xf32> -> vector<24x128xf32>
    %34 = arith.addf %29, %33 : vector<24x128xf32>
    %c6 = arith.constant 6 : index
    %c0_24 = arith.constant 0 : index
    %c0_25 = arith.constant 0 : index
    %35 = vector.load %arg1[%c6, %c0_24, %c0_25] : memref<9x24x4xf32, #tpu.memory_space<vmem>>, vector<1x24x4xf32>
    %36 = vector.shape_cast %35 : vector<1x24x4xf32> to vector<24x4xf32>
    %37 = vector.extract_strided_slice %3 {offsets = [0, 145], sizes = [4, 128], strides = [1, 1]} : vector<4x384xf32> to vector<4x128xf32>
    %cst_26 = arith.constant dense<0.000000e+00> : vector<24x128xf32>
    %38 = tpu.matmul %36, %37, %cst_26 {dimension_numbers = #tpu.dot_dimension_numbers<[1], [0], [0], [1], [0, 0, 1, 1], [], []>} : vector<24x4xf32>, vector<4x128xf32>, vector<24x128xf32> -> vector<24x128xf32>
    %39 = arith.addf %34, %38 : vector<24x128xf32>
    %c7 = arith.constant 7 : index
    %c0_27 = arith.constant 0 : index
    %c0_28 = arith.constant 0 : index
    %40 = vector.load %arg1[%c7, %c0_27, %c0_28] : memref<9x24x4xf32, #tpu.memory_space<vmem>>, vector<1x24x4xf32>
    %41 = vector.shape_cast %40 : vector<1x24x4xf32> to vector<24x4xf32>
    %42 = vector.extract_strided_slice %3 {offsets = [0, 146], sizes = [4, 128], strides = [1, 1]} : vector<4x384xf32> to vector<4x128xf32>
    %cst_29 = arith.constant dense<0.000000e+00> : vector<24x128xf32>
    %43 = tpu.matmul %41, %42, %cst_29 {dimension_numbers = #tpu.dot_dimension_numbers<[1], [0], [0], [1], [0, 0, 1, 1], [], []>} : vector<24x4xf32>, vector<4x128xf32>, vector<24x128xf32> -> vector<24x128xf32>
    %44 = arith.addf %39, %43 : vector<24x128xf32>
    %c8 = arith.constant 8 : index
    %c0_30 = arith.constant 0 : index
    %c0_31 = arith.constant 0 : index
    %45 = vector.load %arg1[%c8, %c0_30, %c0_31] : memref<9x24x4xf32, #tpu.memory_space<vmem>>, vector<1x24x4xf32>
    %46 = vector.shape_cast %45 : vector<1x24x4xf32> to vector<24x4xf32>
    %47 = vector.extract_strided_slice %3 {offsets = [0, 147], sizes = [4, 128], strides = [1, 1]} : vector<4x384xf32> to vector<4x128xf32>
    %cst_32 = arith.constant dense<0.000000e+00> : vector<24x128xf32>
    %48 = tpu.matmul %46, %47, %cst_32 {dimension_numbers = #tpu.dot_dimension_numbers<[1], [0], [0], [1], [0, 0, 1, 1], [], []>} : vector<24x4xf32>, vector<4x128xf32>, vector<24x128xf32> -> vector<24x128xf32>
    %49 = arith.addf %44, %48 : vector<24x128xf32>
    %c0_33 = arith.constant 0 : index
    %c0_34 = arith.constant 0 : index
    %50 = vector.load %arg6[%c0_33, %c0_34] : memref<24x128xf32, #tpu.memory_space<vmem>>, vector<24x128xf32>
    tpu.vector_store %arg6[%c0_33, %c0_34], %49 {strides = array<i32>} : memref<24x128xf32, #tpu.memory_space<vmem>>, vector<24x128xf32>,
    %c0_35 = arith.constant 0 : index
    %c0_36 = arith.constant 0 : index
    %51 = vector.load %arg5[%c0_35, %c0_36] : memref<1x128xf32, #tpu.memory_space<vmem>>, vector<1x128xf32>
    %52 = vector.broadcast %51 : vector<1x128xf32> to vector<24x128xf32>
    %53 = arith.mulf %49, %52 : vector<24x128xf32>
    %cst_37 = arith.constant dense<0.000000e+00> : vector<24xf32>
    %54 = vector.multi_reduction <add>, %53, %cst_37 [1] : vector<24x128xf32> to vector<24xf32>
    %55 = vector.shape_cast %54 : vector<24xf32> to vector<24x1xf32>
    %c0_38 = arith.constant 0 : index
    %c0_39 = arith.constant 0 : index
    %c0_40 = arith.constant 0 : index
    %56 = vector.load %arg7[%c0_38, %c0_39, %c0_40] : memref<1x24x2xf32, #tpu.memory_space<vmem>>, vector<1x24x1xf32>
    %57 = vector.shape_cast %56 : vector<1x24x1xf32> to vector<24x1xf32>
    %58 = vector.shape_cast %55 : vector<24x1xf32> to vector<1x24x1xf32>
    tpu.vector_store %arg7[%c0_38, %c0_39, %c0_40], %58 {strides = array<i32>} : memref<1x24x2xf32, #tpu.memory_space<vmem>>, vector<1x24x1xf32>,
    %59 = arith.mulf %53, %49 : vector<24x128xf32>
    %cst_41 = arith.constant dense<0.000000e+00> : vector<24xf32>
    %60 = vector.multi_reduction <add>, %59, %cst_41 [1] : vector<24x128xf32> to vector<24xf32>
    %61 = vector.shape_cast %60 : vector<24xf32> to vector<24x1xf32>
    %c0_42 = arith.constant 0 : index
    %c0_43 = arith.constant 0 : index
    %c1_44 = arith.constant 1 : index
    %62 = vector.load %arg7[%c0_42, %c0_43, %c1_44] : memref<1x24x2xf32, #tpu.memory_space<vmem>>, vector<1x24x1xf32>
    %63 = vector.shape_cast %62 : vector<1x24x1xf32> to vector<24x1xf32>
    %64 = vector.shape_cast %61 : vector<24x1xf32> to vector<1x24x1xf32>
    tpu.vector_store %arg7[%c0_42, %c0_43, %c1_44], %64 {strides = array<i32>} : memref<1x24x2xf32, #tpu.memory_space<vmem>>, vector<1x24x1xf32>,
    return
  }
  func.func @transform_0(%arg0: i32) -> (i32, i32, i32) {
    %c0_i32 = arith.constant 0 : i32
    %c0_i32_0 = arith.constant 0 : i32
    %c0_i32_1 = arith.constant 0 : i32
    %c0_i32_2 = arith.constant 0 : i32
    return %c0_i32, %c0_i32_0, %c0_i32_1 : i32, i32, i32
  }
  func.func @transform_1(%arg0: i32) -> (i32, i32) {
    %c1_i32 = arith.constant 1 : i32
    %0 = arith.subi %arg0, %c1_i32 : i32
    %c0_i32 = arith.constant 0 : i32
    %1 = arith.maxsi %0, %c0_i32 : i32
    %c0_i32_0 = arith.constant 0 : i32
    %c0_i32_1 = arith.constant 0 : i32
    return %c0_i32_0, %1 : i32, i32
  }
  func.func @transform_2(%arg0: i32) -> (i32, i32) {
    %c0_i32 = arith.constant 0 : i32
    %c0_i32_0 = arith.constant 0 : i32
    return %c0_i32, %arg0 : i32, i32
  }
  func.func @transform_3(%arg0: i32) -> (i32, i32) {
    %c1_i32 = arith.constant 1 : i32
    %0 = arith.addi %arg0, %c1_i32 : i32
    %c5_i32 = arith.constant 5 : i32
    %1 = arith.minsi %0, %c5_i32 : i32
    %c0_i32 = arith.constant 0 : i32
    %c0_i32_0 = arith.constant 0 : i32
    return %c0_i32, %1 : i32, i32
  }
  func.func @transform_4(%arg0: i32) -> (i32, i32) {
    %c0_i32 = arith.constant 0 : i32
    %c0_i32_0 = arith.constant 0 : i32
    return %c0_i32, %arg0 : i32, i32
  }
  func.func @transform_5(%arg0: i32) -> (i32, i32) {
    %c0_i32 = arith.constant 0 : i32
    %c0_i32_0 = arith.constant 0 : i32
    return %c0_i32, %arg0 : i32, i32
  }
  func.func @transform_6(%arg0: i32) -> (i32, i32, i32) {
    %c0_i32 = arith.constant 0 : i32
    %c0_i32_0 = arith.constant 0 : i32
    %c0_i32_1 = arith.constant 0 : i32
    return %arg0, %c0_i32, %c0_i32_0 : i32, i32, i32
  }
}

module attributes {stable_mosaic.version = 11 : i64} {
  func.func @_bn_gates_kernel(%arg0: i32, %arg1: memref<24x1xf32, #tpu.memory_space<vmem>>, %arg2: memref<24x1xf32, #tpu.memory_space<vmem>>, %arg3: memref<24x1xf32, #tpu.memory_space<vmem>>, %arg4: memref<24x128xf32, #tpu.memory_space<vmem>>, %arg5: memref<8x128xf32, #tpu.memory_space<vmem>>) attributes {dimension_semantics = [#tpu.dimension_semantics<parallel>], iteration_bounds = array<i64: 6>, scalar_prefetch = 0 : i64, scratch_operands = 0 : i64, tpu.core_type = #tpu.core_type<tc>, window_params = [{pipeline_mode = #tpu.pipeline_mode<synchronous>, transform_indices = @transform_0, window_bounds = array<i64: 24, 1>}, {pipeline_mode = #tpu.pipeline_mode<synchronous>, transform_indices = @transform_1, window_bounds = array<i64: 24, 1>}, {pipeline_mode = #tpu.pipeline_mode<synchronous>, transform_indices = @transform_2, window_bounds = array<i64: 24, 1>}, {transform_indices = @transform_3, window_bounds = array<i64: 24, 128>}, {transform_indices = @transform_4, window_bounds = array<i64: 8, 128>}]} {
    %c0 = arith.constant 0 : index
    %c0_0 = arith.constant 0 : index
    %0 = vector.load %arg4[%c0, %c0_0] : memref<24x128xf32, #tpu.memory_space<vmem>>, vector<24x128xf32>
    %c0_1 = arith.constant 0 : index
    %c0_2 = arith.constant 0 : index
    %1 = vector.load %arg1[%c0_1, %c0_2] : memref<24x1xf32, #tpu.memory_space<vmem>>, vector<24x1xf32>
    %2 = vector.broadcast %1 : vector<24x1xf32> to vector<24x128xf32>
    %3 = arith.mulf %0, %2 : vector<24x128xf32>
    %c0_3 = arith.constant 0 : index
    %c0_4 = arith.constant 0 : index
    %4 = vector.load %arg2[%c0_3, %c0_4] : memref<24x1xf32, #tpu.memory_space<vmem>>, vector<24x1xf32>
    %5 = vector.broadcast %4 : vector<24x1xf32> to vector<24x128xf32>
    %6 = arith.addf %3, %5 : vector<24x128xf32>
    %cst = arith.constant 0.000000e+00 : f32
    %7 = vector.broadcast %cst : f32 to vector<24x128xf32>
    %8 = arith.maximumf %6, %7 : vector<24x128xf32>
    %c0_5 = arith.constant 0 : index
    %c0_6 = arith.constant 0 : index
    %9 = vector.load %arg3[%c0_5, %c0_6] : memref<24x1xf32, #tpu.memory_space<vmem>>, vector<24x1xf32>
    %10 = vector.broadcast %9 : vector<24x1xf32> to vector<24x128xf32>
    %11 = arith.addf %8, %10 : vector<24x128xf32>
    %12 = vector.extract_strided_slice %11 {offsets = [0, 0], sizes = [8, 128], strides = [1, 1]} : vector<24x128xf32> to vector<8x128xf32>
    %13 = arith.negf %12 : vector<8x128xf32>
    %14 = math.exp %13 : vector<8x128xf32>
    %cst_7 = arith.constant 1.000000e+00 : f32
    %15 = vector.broadcast %cst_7 : f32 to vector<8x128xf32>
    %16 = arith.addf %15, %14 : vector<8x128xf32>
    %17 = arith.divf %15, %16 : vector<8x128xf32>
    %18 = vector.extract_strided_slice %11 {offsets = [8, 0], sizes = [8, 128], strides = [1, 1]} : vector<24x128xf32> to vector<8x128xf32>
    %19 = arith.negf %18 : vector<8x128xf32>
    %20 = math.exp %19 : vector<8x128xf32>
    %cst_8 = arith.constant 1.000000e+00 : f32
    %21 = vector.broadcast %cst_8 : f32 to vector<8x128xf32>
    %22 = arith.addf %21, %20 : vector<8x128xf32>
    %23 = arith.divf %21, %22 : vector<8x128xf32>
    %24 = vector.extract_strided_slice %11 {offsets = [16, 0], sizes = [8, 128], strides = [1, 1]} : vector<24x128xf32> to vector<8x128xf32>
    %25 = math.tanh %24 : vector<8x128xf32>
    %26 = arith.mulf %17, %25 : vector<8x128xf32>
    %27 = math.tanh %26 : vector<8x128xf32>
    %28 = arith.mulf %23, %27 : vector<8x128xf32>
    %c0_9 = arith.constant 0 : index
    %c0_10 = arith.constant 0 : index
    %29 = vector.load %arg5[%c0_9, %c0_10] : memref<8x128xf32, #tpu.memory_space<vmem>>, vector<8x128xf32>
    tpu.vector_store %arg5[%c0_9, %c0_10], %28 {strides = array<i32>} : memref<8x128xf32, #tpu.memory_space<vmem>>, vector<8x128xf32>,
    return
  }
  func.func @transform_0(%arg0: i32) -> (i32, i32) {
    %c0_i32 = arith.constant 0 : i32
    %c0_i32_0 = arith.constant 0 : i32
    %c0_i32_1 = arith.constant 0 : i32
    return %c0_i32, %c0_i32_0 : i32, i32
  }
  func.func @transform_1(%arg0: i32) -> (i32, i32) {
    %c0_i32 = arith.constant 0 : i32
    %c0_i32_0 = arith.constant 0 : i32
    %c0_i32_1 = arith.constant 0 : i32
    return %c0_i32, %c0_i32_0 : i32, i32
  }
  func.func @transform_2(%arg0: i32) -> (i32, i32) {
    %c0_i32 = arith.constant 0 : i32
    %c0_i32_0 = arith.constant 0 : i32
    %c0_i32_1 = arith.constant 0 : i32
    return %c0_i32, %c0_i32_0 : i32, i32
  }
  func.func @transform_3(%arg0: i32) -> (i32, i32) {
    %c0_i32 = arith.constant 0 : i32
    %c0_i32_0 = arith.constant 0 : i32
    return %c0_i32, %arg0 : i32, i32
  }
  func.func @transform_4(%arg0: i32) -> (i32, i32) {
    %c0_i32 = arith.constant 0 : i32
    %c0_i32_0 = arith.constant 0 : i32
    return %c0_i32, %arg0 : i32, i32
  }
}

</mosaic_0001>

<bundles_post_ra>
// kernel: convrnn_forward.3
= control target key start
LH: loop header
LB: loop body
LE: loop exit
PB: predicated region body
PF: predicated region fallthrough
CT: control target
= control target key end

     0   :  { %s485_s15 = smov 0   ;;  %s487_s16 = smov 0   ;;  %s566_s0 = inlined_call_operand.vmem [shape: f32[24,1], index: 0, kind: input, shape index: {}]   ;;  %s567_s1 = inlined_call_operand.vmem [shape: f32[24,1], index: 1, kind: input, shape index: {}]   ;;  %s568_s2 = inlined_call_operand.vmem [shape: f32[24,1], index: 2, kind: input, shape index: {}]   ;;  %s569_s3 = inlined_call_operand.vmem [shape: f32[24,768], index: 3, kind: input, shape index: {}]   ;;  %s570_s4 = inlined_call_operand.vmem [shape: f32[8,768], index: 4, kind: output, shape index: {}]  }
   0x1   :  { %s489_s17 = smov 0  }
   0x2 LB: > { %s383_s18 = sadd.s32 4294967295, %s457_s17   ;;  %s502_s19 = sadd.s32 1, %s457_s17   ;;  %s457_s17 = sphi %s489_s17, %s573_s17   ;;  %s453_s16 = sphi %s487_s16, %s572_s16   ;;  %s449_s15 = sphi %s485_s15, %s571_s15  }
   0x3   : > { %s81_s20 = ssub.s32 %s457_s17, %s502_s19  ;;  %s84_s21 = sadd.s32 1, %s453_s16 }
   0x4   : > { %p82_p0 = scmp.eq.s32.totalorder %s81_s20, 0  ;;  %p91_p1 = scmp.ne.s32.totalorder %s453_s16, %s449_s15 }
   0x5   : > { %p92_p2 = scmp.eq.s32.totalorder %s457_s17, 0  ;;  %p386_p4 = scmp.ge.s32.totalorder %s457_s17, 6 }
   0x6   : > { %s511_s22 = scalar_select %p82_p0, %s453_s16, %s84_s21  }
   0x7   : > { %p93_p3 = por %p92_p2, %p91_p1  ;;  %152 = sbr.rel (%p386_p4) target bundleno = 21 (0x15), region = 28 }
   0xe   : > { %155 = sbr.rel (!%p93_p3) target bundleno = 21 (0x15), region = 32  ;;  %s157_s23 = sand.u32 (%p93_p3), 1, %s453_s16  }
   0xf   : > { %s387_s24 = sshll.u32 (%p93_p3), %s457_s17, 3  ;;  %s394_s25 = smul.u32 (%p93_p3), 24, %s157_s23 }
  0x10   : > { %s161_s28 = scalar_lea.vmem (%p93_p3), %s569_s3, %s387_s24 }
  0x11   : > { %v193_v0 = vld [vmem:[%s161_s28] sm:$0xff] (%p93_p3)  ;;  %v195_v1 = vld [vmem:[%s161_s28 + $0x30] sm:$0xff] (%p93_p3)  ;;  %s159_s29 = scalar_lea.vmem (%p93_p3), [#allocation2], %s394_s25 }
  0x12   : > { %v197_v2 = vld [vmem:[%s161_s28 + $0x60] sm:$0xff] (%p93_p3)  ;;  %194 = vst [vmem:[%s159_s29] sm:$0xff] (%p93_p3), %v193_v0  ;;  %196 = vst [vmem:[%s159_s29 + $0x8] sm:$0xff] (%p93_p3), %v195_v1 }
  0x13   : > { %198 = vst [vmem:[%s159_s29 + $0x10] sm:$0xff] (%p93_p3), %v197_v2 }
  0x15 PF: > { %p388_p5 = scmp.ge.s32.totalorder %s457_s17, 1  ;;  %p203_p6 = scmp.lt.s32.totalorder %s457_s17, 7 }
  0x17   : > { %p204_p7 = pnand %p388_p5, %p203_p6 }
  0x18   : > { %v286_v3 = vld [vmem:[%s568_s2] sm:$0xff] (!%p204_p7)  ;;  %v459_v5 = vmov (!%p204_p7), 0   ;;  %v242_v6 = vld [vmem:[%s566_s0 + $0x8] sm:$0xff] (!%p204_p7)  ;;  %v243_v9 = vld [vmem:[%s566_s0 + $0x10] sm:$0xff] (!%p204_p7)  ;;  %s210_s28 = sand.u32 (!%p204_p7), 1, %s449_s15   ;;  %p234_p8 = scmp.lt.s32.totalorder (!%p204_p7), %s383_s18, 5 }
  0x19   : > { %207 = sbr.rel (%p204_p7) target bundleno = 206 (0xce), region = 70  ;;  %v241_v4 = vld [vmem:[%s566_s0] sm:$0xff] (!%p204_p7)  ;;  %422 = vset.pattern.permute.xlu1 (!%p204_p7), %v459_v5  ;;  %421 = vset.pattern.permute.xlu0 (!%p204_p7), %v459_v5  ;;  %v263_v8 = vld [vmem:[%s567_s1 + $0x8] sm:$0xff] (!%p204_p7)  ;;  %v264_v11 = vld [vmem:[%s567_s1 + $0x10] sm:$0xff] (!%p204_p7) }
  0x1a   : > { %291 = vperm.xlu1 (!%p204_p7), %422, %v286_v3   ;;  %246 = vperm.xlu0 (!%p204_p7), %421, %v241_v4   ;;  %v262_v7 = vld [vmem:[%s567_s1] sm:$0xff] (!%p204_p7)  ;;  %v287_v10 = vld [vmem:[%s568_s2 + $0x8] sm:$0xff] (!%p204_p7)  ;;  %v288_v12 = vld [vmem:[%s568_s2 + $0x10] sm:$0xff] (!%p204_p7)  ;;  %s395_s29 = smul.u32 (!%p204_p7), 24, %s210_s28 }
  0x1c   : > { %s212_s30 = scalar_lea.vmem (!%p204_p7), [#allocation2], %s395_s29 }
  0x1d   : > { %v238_v15 = vld [vmem:[%s212_s30] sm:$0xff] (!%p204_p7)  ;;  %v239_v16 = vld [vmem:[%s212_s30 + $0x8] sm:$0xff] (!%p204_p7)  ;;  %v240_v25 = vld [vmem:[%s212_s30 + $0x10] sm:$0xff] (!%p204_p7) }
  0x1e   : > { %251 = vperm.xlu1 (!%p204_p7), %422, %v242_v6   ;;  %267 = vperm.xlu0 (!%p204_p7), %421, %v262_v7  }
  0x20   : > { %s575_s18 = smov (!%p234_p8, %s383_s18), 5 }
  0x21   : > { %s389_s15 = sshll.u32 %s575_s18, 3 }
  0x22   : > { %272 = vperm.xlu1 %422, %v263_v8   ;;  %256 = vperm.xlu0 %421, %v243_v9   ;;  %s237_s7 = scalar_lea.vmem %s570_s4, %s389_s15 }
  0x26   : > { %296 = vperm.xlu1 %422, %v287_v10   ;;  %277 = vperm.xlu0 %421, %v264_v11  }
  0x2a   : > { %301 = vperm.xlu0 %421, %v288_v12  }
  0x99   : > { %v292_v13 = vpop.permute.xlu1 %291  ;;  %v247_v14 = vpop.permute.xlu0 %246 }
  0x9a   : > { %v259_v17 = vmul.f32 %v247_v14, %v238_v15 }
  0x9d   : > { %v252_v18 = vpop.permute.xlu1 %251  ;;  %v268_v19 = vpop.permute.xlu0 %267 }
  0x9e   : > { %v260_v20 = vmul.f32 %v252_v18, %v239_v16  ;;  %v280_v21 = vadd.f32 %v268_v19, %v259_v17 }
  0xa0   : > { %v283_v22 = vmax.f32 %v280_v21, 0.0 }
  0xa1   : > { %v273_v23 = vpop.permute.xlu1 %272  ;;  %v257_v24 = vpop.permute.xlu0 %256 }
  0xa2   : > { %v304_v26 = vadd.f32 %v292_v13, %v283_v22  ;;  %v281_v27 = vadd.f32 %v273_v23, %v260_v20  ;;  %v261_v30 = vmul.f32 %v257_v24, %v240_v25 }
  0xa4   : > { %v390_v28 = vmul.f32 -1.442695, %v304_v26  ;;  %v284_v29 = vmax.f32 %v281_v27, 0.0 }
  0xa5   : > { %v297_v31 = vpop.permute.xlu1 %296  ;;  %v278_v32 = vpop.permute.xlu0 %277 }
  0xa6   : > { %423 = vpow2.f32 %v390_v28  ;;  %v305_v33 = vadd.f32 %v297_v31, %v284_v29  ;;  %v282_v34 = vadd.f32 %v278_v32, %v261_v30 }
  0xa8   : > { %v391_v35 = vmul.f32 -1.442695, %v305_v33  ;;  %v285_v36 = vmax.f32 %v282_v34, 0.0 }
  0xa9   : > { %v302_v37 = vpop.permute.xlu0 %301 }
  0xaa   : > { %425 = vpow2.f32 %v391_v35  ;;  %v306_v38 = vadd.f32 %v302_v37, %v285_v36 }
  0xac   : > { %427 = vtanh.f32 %v306_v38 }
  0xb0   : > { %v424_v39 = vpop.eup %423 }
  0xb1   : > { %v310_v40 = vadd.f32 1.0, %v424_v39 }
  0xb3   : > { %429 = vrcp.f32 %v310_v40 }
  0xb4   : > { %v426_v41 = vpop.eup %425 }
  0xb5   : > { %v316_v42 = vadd.f32 1.0, %v426_v41 }
  0xb6   : > { %v428_v43 = vpop.eup %427 }
  0xb7   : > { %431 = vrcp.f32 %v316_v42 }
  0xbd   : > { %v430_v44 = vpop.eup %429 }
  0xbe   : > { %v320_v45 = vmul.f32 %v430_v44, %v428_v43 }
  0xc0   : > { %433 = vtanh.f32 %v320_v45 }
  0xc1   : > { %v432_v46 = vpop.eup %431 }
  0xca   : > { %v434_v47 = vpop.eup %433 }
  0xcb   : > { %v322_v48 = vmul.f32 %v434_v47, %v432_v46 }
  0xcd   : > { %323 = vst [vmem:[%s237_s7] sm:$0xff] %v322_v48 }
  0xce PF: > { %p11_p9 = scmp.ge.s32.totalorder %s502_s19, 8   ;;  %s571_s15 = smov %s453_s16 }
  0xcf   : > { %s572_s16 = smov %s511_s22  ;;  %s573_s17 = smov %s502_s19 }
  0xd0   :  { %13 = sbr.rel (!%p11_p9) target bundleno = 2 (0x2), region = 109 }

// kernel: convrnn_forward.2
= control target key start
LH: loop header
LB: loop body
LE: loop exit
PB: predicated region body
PF: predicated region fallthrough
CT: control target
= control target key end

     0   :  { %s1850_s21 = smov 0   ;;  %s1852_s22 = smov 0   ;;  %s2135_s0 = inlined_call_operand.vmem [shape: f32[9,24,4], index: 0, kind: input, shape index: {}]   ;;  %s2136_s1 = inlined_call_operand.vmem [shape: f32[4,768], index: 1, kind: input, shape index: {}, may-alias: {1,2,3}]   ;;  %s2137_s2 = inlined_call_operand.vmem [shape: f32[4,768], index: 2, kind: input, shape index: {}, may-alias: {1,2,3}]   ;;  %s2138_s3 = inlined_call_operand.vmem [shape: f32[4,768], index: 3, kind: input, shape index: {}, may-alias: {1,2,3}]   ;;  %s2139_s4 = inlined_call_operand.vmem [shape: f32[1,768], index: 4, kind: input, shape index: {}]   ;;  %s2140_s5 = inlined_call_operand.vmem [shape: f32[24,768], index: 5, kind: output, shape index: {0}]   ;;  %s2141_s6 = inlined_call_operand.vmem [shape: f32[6,24,2], index: 6, kind: output, shape index: {1}]  }
   0x1   :  { %s1854_s23 = smov 0  }
   0x2 LB: > { %s1863_s24 = sadd.s32 4294967295, %s1803_s23   ;;  %s1865_s25 = sadd.s32 1, %s1803_s23   ;;  %s1803_s23 = sphi %s1854_s23, %s2146_s23   ;;  %s1799_s22 = sphi %s1852_s22, %s2145_s22   ;;  %s1795_s21 = sphi %s1850_s21, %s2144_s21  }
   0x3   : > { %s158_s26 = ssub.s32 %s1803_s23, %s1865_s25  ;;  %s161_s27 = sadd.s32 1, %s1799_s22 }
   0x4   : > { %p159_p0 = scmp.eq.s32.totalorder %s158_s26, 0  ;;  %p171_p1 = scmp.ne.s32.totalorder %s1799_s22, %s1795_s21 }
   0x5   : > { %p172_p2 = scmp.eq.s32.totalorder %s1863_s24, 5  ;;  %p1483_p3 = scmp.ge.s32.totalorder %s1803_s23, 1 }
   0x6   : > { %s1873_s28 = scalar_select %p159_p0, %s1799_s22, %s161_s27  }
   0x7   : > { %p1875_p4 = por %p172_p2, %p171_p1  ;;  %p264_p5 = scmp.lt.s32.totalorder %s1803_s23, 7 }
   0x9   : > { %p265_p6 = pnand %p1483_p3, %p264_p5 }
   0xa   : > { %p324_p7 = scmp.lt.s32.totalorder (!%p265_p6), %s1863_s24, 5  ;;  %s1484_s30 = sadd.s32 (!%p265_p6), 4294967295, %s1863_s24  ;;  %v1805_v0 = vmov (!%p265_p6), 0.0   ;;  %vm1806_vm0 = vmmov (!%p265_p6), 0   ;;  %vm374_vm1 = vcmask (!%p265_p6), 1043456   ;;  %vm364_vm2 = vcmask (!%p265_p6), 31744  }
   0xb   : > { %268 = sbr.rel (%p265_p6) target bundleno = 561 (0x231), region = 40  ;;  %1643 = vmatprep.subr.mxu0 (!%p265_p6), %v1805_v0  ;;  %1645 = vmatprep.mubr.msk.f32.mxu0 (!%p265_p6), %vm1806_vm0, %v1805_v0  ;;  %p315_p8 = scmp.gt.s32.totalorder (!%p265_p6), %s1484_s30, 0  ;;  %v1522_v1 = vld [vmem:[%s2135_s0 + $0x60] sm:$0xff] (!%p265_p6)  ;;  %vm869_vm3 = vcmask (!%p265_p6), 1039360   ;;  %v1529_v8 = vld [vmem:[%s2135_s0 + $0x78] sm:$0xff] (!%p265_p6)  ;;  %vm362_vm4 = vcmask (!%p265_p6), 146432  }
   0xc   : > { %1599 = vmatprep.subr.mxu1 (!%p265_p6), %v1805_v0  ;;  %1601 = vmatprep.mubr.msk.f32.mxu1 (!%p265_p6), %vm1806_vm0, %v1805_v0  ;;  %p1485_p9 = scmp.lt.s32.totalorder (!%p265_p6), %s1484_s30, 5  ;;  %s328_s9 = sadd.s32 (!%p265_p6), 1, %s1863_s24  ;;  %v1497_v11 = vld [vmem:[%s2135_s0 + $0x18] sm:$0xff] (!%p265_p6)  ;;  %v1530_v14 = vld [vmem:[%s2135_s0 + $0x80] sm:$0xff] (!%p265_p6)  ;;  %vm461_vm5 = vcmask (!%p265_p6), 154624   ;;  %v1531_v18 = vld [vmem:[%s2135_s0 + $0x88] sm:$0xff] (!%p265_p6) }
   0xd   : > { %p1895_p10 = scmp.lt.s32.totalorder (!%p265_p6), %s328_s9, 5  ;;  %s1807_s17 = smov (!%p265_p6), 127   ;;  %v1498_v16 = vld [vmem:[%s2135_s0 + $0x20] sm:$0xff] (!%p265_p6)  ;;  %vm973_vm6 = vcmask (!%p265_p6), 908288   ;;  %v1499_v21 = vld [vmem:[%s2135_s0 + $0x28] sm:$0xff] (!%p265_p6)  ;;  %v1536_v23 = vld [vmem:[%s2135_s0 + $0x90] sm:$0xff] (!%p265_p6) }
   0xe   : > { %s1808_s10 = smov (!%p265_p6), 18   ;;  %s1809_s11 = smov (!%p265_p6), 19   ;;  %vm562_vm7 = vcmask (!%p265_p6), 138240   ;;  %v349_v25 = vld [vmem:[%s2135_s0] sm:$0xff] (!%p265_p6)  ;;  %v1537_v27 = vld [vmem:[%s2135_s0 + $0x98] sm:$0xff] (!%p265_p6)  ;;  %vm1077_vm8 = vcmask (!%p265_p6), 900096  }
   0xf   : > { %s1812_s13 = smov (!%p265_p6), 110   ;;  %s1813_s14 = smov (!%p265_p6), 1   ;;  %v350_v30 = vld [vmem:[%s2135_s0 + $0x8] sm:$0xff] (!%p265_p6)  ;;  %v1538_v32 = vld [vmem:[%s2135_s0 + $0xa0] sm:$0xff] (!%p265_p6)  ;;  %v351_v35 = vld [vmem:[%s2135_s0 + $0x10] sm:$0xff] (!%p265_p6)  ;;  %vm1181_vm9 = vcmask (!%p265_p6), 891904  }
  0x10   : > { %s1814_s15 = smov (!%p265_p6), 109   ;;  %v1543_v37 = vld [vmem:[%s2135_s0 + $0xa8] sm:$0xff] (!%p265_p6)  ;;  %vm666_vm10 = vcmask (!%p265_p6), 7168   ;;  %v1508_v39 = vld [vmem:[%s2135_s0 + $0x30] sm:$0xff] (!%p265_p6)  ;;  %v1509_v44 = vld [vmem:[%s2135_s0 + $0x38] sm:$0xff] (!%p265_p6)  ;;  %vm1308_vm11 = vcmask (!%p265_p6), 15368  }
  0x11   : > { %v1544_v41 = vld [vmem:[%s2135_s0 + $0xb0] sm:$0xff] (!%p265_p6)  ;;  %v1545_v45 = vld [vmem:[%s2135_s0 + $0xb8] sm:$0xff] (!%p265_p6)  ;;  %v1510_v46 = vld [vmem:[%s2135_s0 + $0x40] sm:$0xff] (!%p265_p6) }
  0x12   : > { %s1885_s7 = scalar_select %p324_p7, %s1863_s24, 5  ;;  %v1550_v47 = vld [vmem:[%s2135_s0 + $0xc0] sm:$0xff]  ;;  %v1515_v48 = vld [vmem:[%s2135_s0 + $0x48] sm:$0xff]  ;;  %v1516_v50 = vld [vmem:[%s2135_s0 + $0x50] sm:$0xff] }
  0x13   : > { %s316_s16 = scalar_select %p315_p8, %s1484_s30, 0  ;;  %v1551_v49 = vld [vmem:[%s2135_s0 + $0xc8] sm:$0xff]  ;;  %v1552_v51 = vld [vmem:[%s2135_s0 + $0xd0] sm:$0xff]  ;;  %v1517_v52 = vld [vmem:[%s2135_s0 + $0x58] sm:$0xff] }
  0x14   : > { %s1491_s8 = sshll.u32 %s1885_s7, 2  ;;  %s2148_s9 = smov (!%p1895_p10, %s328_s9), 5  ;;  %v1523_v53 = vld [vmem:[%s2135_s0 + $0x68] sm:$0xff]  ;;  %v1524_v54 = vld [vmem:[%s2135_s0 + $0x70] sm:$0xff] }
  0x15   : > { %s327_s12 = scalar_lea.vmem %s2137_s2, %s1491_s8  ;;  %s2150_s16 = smov (!%p1485_p9, %s316_s16), 5 }
  0x16   : > { %v1902_v2 = vld [vmem:[%s327_s12] sm:$0xf]  ;;  %s2152_s9 = smov (!%p1895_p10, %s2148_s9), 5  ;;  %s1490_s18 = sshll.u32 %s2150_s16, 2 }
  0x17   : > { %865 = vrot.lane.b32.xlu1 %v1902_v2, %s1807_s17  ;;  %1644 = vmatpush3.msk.msra.mxu0 %vm374_vm1, %v1902_v2  ;;  %s320_s23 = scalar_lea.vmem %s2136_s1, %s1490_s18  ;;  %s1495_s26 = sshll.u32 %s2152_s9, 2 }
  0x18   : > { %1646 = vmatmul.mubr.msk.f32.vlgmr.msra.gmra.mrb[0].mxu0 %vm364_vm2, %v1522_v1  ;;  %1654 = vmatprep.subr.mxu0 %v1805_v0  ;;  %v346_v3 = vld [vmem:[%s320_s23] sm:$0xf]  ;;  %s334_s30 = scalar_lea.vmem %s2138_s3, %s1495_s26  ;;  %s1810_s12 = smov 111  }
  0x19   : > { %1656 = vmatprep.mubr.msk.f32.mxu0 %vm1806_vm0, %v1805_v0  ;;  %358 = vrot.lane.b32.xlu0 %v346_v3, %s1808_s10  ;;  %v348_v4 = vld [vmem:[%s334_s30] sm:$0xf]  ;;  %s1811_s9 = smov 17   ;;  %s340_s23 = scalar_lea.vmem %s2139_s4, %s1885_s7 }
  0x1a   : > { %v1557_v58 = vld [vmem:[%s340_s23] ss:$0 sm:$0xff] }
  0x1b   : > { %867 = vrot.lane.b32.xlu1 %v348_v4, %s1807_s17  ;;  %s304_s17 = sand.u32 1, %s1795_s21   ;;  %s1746_s21 = smul.u32 24, %s1885_s7 }
  0x1c   : > { %s1745_s18 = smul.u32 24, %s304_s17  ;;  %s1558_s7 = sshll.u32 (%p1875_p4), %s1863_s24, 3 }
  0x1d   : > { %360 = vrot.lane.b32.xlu0 %v1902_v2, %s1808_s10  ;;  %s345_s30 = scalar_lea.vmem %s2141_s6, %s1746_s21 }
  0x1e   : > { %s2104_s26 = scalar_lea.vmem [#allocation2], %s1745_s18 }
  0x1f   : > { %459 = vrot.lane.b32.xlu1 %v1902_v2, %s1809_s11 }
  0x21   : > { %457 = vrot.lane.b32.xlu0 %v346_v3, %s1809_s11 }
  0x23   : > { %971 = vrot.lane.b32.xlu1 %v348_v4, %s1810_s12 }
  0x25   : > { %969 = vrot.lane.b32.xlu0 %v1902_v2, %s1810_s12  ;;  %s1325_s12 = scalar_lea.vmem (%p1875_p4), %s2140_s5, %s1558_s7 }
  0x27   : > { %560 = vrot.lane.b32.xlu1 %v1902_v2, %s1811_s9 }
  0x29   : > { %558 = vrot.lane.b32.xlu0 %v346_v3, %s1811_s9 }
  0x2b   : > { %1075 = vrot.lane.b32.xlu1 %v348_v4, %s1812_s13 }
  0x2d   : > { %1073 = vrot.lane.b32.xlu0 %v1902_v2, %s1812_s13 }
  0x2f   : > { %664 = vrot.lane.b32.xlu1 %v1902_v2, %s1813_s14 }
  0x31   : > { %662 = vrot.lane.b32.xlu0 %v346_v3, %s1813_s14 }
  0x33   : > { %1179 = vrot.lane.b32.xlu1 %v348_v4, %s1814_s15 }
  0x35   : > { %1177 = vrot.lane.b32.xlu0 %v1902_v2, %s1814_s15 }
  0x89   : > { %v866_v5 = vpop.permute.xlu1 %865 }
  0x8b   : > { %v359_v6 = vpop.permute.xlu0 %358 }
  0x8d   : > { %v868_v7 = vpop.permute.xlu1 %867 }
  0x8e   : > { %v870_v9 = vsel %vm869_vm3, %v866_v5, %v868_v7 }
  0x8f   : > { %1655 = vmatpush3.msk.msra.mxu0 %vm374_vm1, %v870_v9  ;;  %v361_v10 = vpop.permute.xlu0 %360 }
  0x90   : > { %1657 = vmatmul.mubr.msk.f32.vlgmr.msra.gmra.mrb[0].mxu0 %vm364_vm2, %v1529_v8  ;;  %1665 = vmatprep.subr.mxu0 %v1805_v0  ;;  %v363_v12 = vsel %vm362_vm4, %v359_v6, %v361_v10 }
  0x91   : > { %1659 = vmatprep.mubr.msk.f32.mxu0 %vm1806_vm0, %v1805_v0  ;;  %v460_v13 = vpop.permute.xlu1 %459  ;;  %1600 = vmatpush3.msk.msra.mxu1 %vm374_vm1, %v363_v12 }
  0x92   : > { %1602 = vmatmul.mubr.msk.f32.vlgmr.msra.gmra.mrb[0].mxu1 %vm364_vm2, %v1497_v11  ;;  %1610 = vmatprep.subr.mxu1 %v1805_v0 }
  0x93   : > { %v458_v15 = vpop.permute.xlu0 %457  ;;  %1604 = vmatprep.mubr.msk.f32.mxu1 %vm1806_vm0, %v1805_v0 }
  0x94   : > { %1660 = vmatmul.mubr.msk.f32.gmra.mrb[2].mxu0 %vm364_vm2, %v1530_v14  ;;  %v462_v17 = vsel %vm461_vm5, %v458_v15, %v460_v13 }
  0x95   : > { %1662 = vmatprep.mubr.msk.f32.mxu0 %vm1806_vm0, %v1805_v0  ;;  %v972_v19 = vpop.permute.xlu1 %971  ;;  %1611 = vmatpush3.msk.msra.mxu1 %vm374_vm1, %v462_v17 }
  0x96   : > { %1605 = vmatmul.mubr.msk.f32.gmra.mrb[2].mxu1 %vm364_vm2, %v1498_v16  ;;  %1621 = vmatprep.subr.mxu1 %v1805_v0 }
  0x97   : > { %v970_v20 = vpop.permute.xlu0 %969  ;;  %1607 = vmatprep.mubr.msk.f32.mxu1 %vm1806_vm0, %v1805_v0 }
  0x98   : > { %1663 = vmatmul.mubr.msk.f32.gmra.mrb[4].mxu0 %vm364_vm2, %v1531_v18  ;;  %v974_v22 = vsel %vm973_vm6, %v970_v20, %v972_v19 }
  0x99   : > { %1667 = vmatprep.mubr.msk.f32.mxu0 %vm1806_vm0, %v1805_v0  ;;  %v561_v24 = vpop.permute.xlu1 %560  ;;  %1666 = vmatpush3.msk.msra.mxu0 %vm374_vm1, %v974_v22 }
  0x9a   : > { %1608 = vmatmul.mubr.msk.f32.gmra.mrb[4].mxu1 %vm364_vm2, %v1499_v21  ;;  %1676 = vmatprep.subr.mxu0 %v1805_v0 }
  0x9b   : > { %1612 = vmatprep.mubr.msk.f32.mxu1 %vm1806_vm0, %v1805_v0  ;;  %v559_v26 = vpop.permute.xlu0 %558 }
  0x9c   : > { %1668 = vmatmul.mubr.msk.f32.vlgmr.msra.gmra.mrb[0].mxu0 %vm364_vm2, %v1536_v23  ;;  %v563_v29 = vsel %vm562_vm7, %v559_v26, %v561_v24 }
  0x9d   : > { %1670 = vmatprep.mubr.msk.f32.mxu0 %vm1806_vm0, %v1805_v0  ;;  %v1076_v28 = vpop.permute.xlu1 %1075 }
  0x9e   : > { %1613 = vmatmul.mubr.msk.f32.vlgmr.msra.gmra.mrb[0].mxu1 %vm364_vm2, %v349_v25 }
  0x9f   : > { %1615 = vmatprep.mubr.msk.f32.mxu1 %vm1806_vm0, %v1805_v0  ;;  %v1074_v31 = vpop.permute.xlu0 %1073  ;;  %1622 = vmatpush3.msk.msra.mxu1 %vm374_vm1, %v563_v29 }
  0xa0   : > { %1671 = vmatmul.mubr.msk.f32.gmra.mrb[2].mxu0 %vm364_vm2, %v1537_v27  ;;  %v1078_v33 = vsel %vm1077_vm8, %v1074_v31, %v1076_v28  ;;  %1632 = vmatprep.subr.mxu1 %v1805_v0 }
  0xa1   : > { %1673 = vmatprep.mubr.msk.f32.mxu0 %vm1806_vm0, %v1805_v0  ;;  %v665_v34 = vpop.permute.xlu1 %664  ;;  %1677 = vmatpush3.msk.msra.mxu0 %vm374_vm1, %v1078_v33 }
  0xa2   : > { %1616 = vmatmul.mubr.msk.f32.gmra.mrb[2].mxu1 %vm364_vm2, %v350_v30  ;;  %1687 = vmatprep.subr.mxu0 %v1805_v0 }
  0xa3   : > { %1618 = vmatprep.mubr.msk.f32.mxu1 %vm1806_vm0, %v1805_v0  ;;  %v663_v36 = vpop.permute.xlu0 %662 }
  0xa4   : > { %1674 = vmatmul.mubr.msk.f32.gmra.mrb[4].mxu0 %vm364_vm2, %v1538_v32  ;;  %v667_v43 = vsel %vm666_vm10, %v663_v36, %v665_v34 }
  0xa5   : > { %1678 = vmatprep.mubr.msk.f32.mxu0 %vm1806_vm0, %v1805_v0  ;;  %v1180_v38 = vpop.permute.xlu1 %1179 }
  0xa6   : > { %1619 = vmatmul.mubr.msk.f32.gmra.mrb[4].mxu1 %vm364_vm2, %v351_v35 }
  0xa7   : > { %1623 = vmatprep.mubr.msk.f32.mxu1 %vm1806_vm0, %v1805_v0  ;;  %v1178_v40 = vpop.permute.xlu0 %1177 }
  0xa8   : > { %1679 = vmatmul.mubr.msk.f32.vlgmr.msra.gmra.mrb[0].mxu0 %vm364_vm2, %v1543_v37  ;;  %v1182_v42 = vsel %vm1181_vm9, %v1178_v40, %v1180_v38 }
  0xa9   : > { %1681 = vmatprep.mubr.msk.f32.mxu0 %vm1806_vm0, %v1805_v0  ;;  %1688 = vmatpush3.msk.msra.mxu0 %vm374_vm1, %v1182_v42 }
  0xaa   : > { %1624 = vmatmul.mubr.msk.f32.vlgmr.msra.gmra.mrb[0].mxu1 %vm364_vm2, %v1508_v39 }
  0xab   : > { %1626 = vmatprep.mubr.msk.f32.mxu1 %vm1806_vm0, %v1805_v0  ;;  %1633 = vmatpush3.msk.msra.mxu1 %vm374_vm1, %v667_v43 }
  0xac   : > { %1682 = vmatmul.mubr.msk.f32.gmra.mrb[2].mxu0 %vm364_vm2, %v1544_v41  ;;  %1698 = vmatprep.subr.mxu1 %v1805_v0 }
  0xad   : > { %1684 = vmatprep.mubr.msk.f32.mxu0 %vm1806_vm0, %v1805_v0 }
  0xae   : > { %1627 = vmatmul.mubr.msk.f32.gmra.mrb[2].mxu1 %vm364_vm2, %v1509_v44 }
  0xaf   : > { %1629 = vmatprep.mubr.msk.f32.mxu1 %vm1806_vm0, %v1805_v0 }
  0xb0   : > { %1685 = vmatmul.mubr.msk.f32.gmra.mrb[4].mxu0 %vm364_vm2, %v1545_v45 }
  0xb1   : > { %1689 = vmatprep.mubr.msk.f32.mxu0 %vm1806_vm0, %v1805_v0 }
  0xb2   : > { %1630 = vmatmul.mubr.msk.f32.gmra.mrb[4].mxu1 %vm364_vm2, %v1510_v46 }
  0xb3   : > { %1634 = vmatprep.mubr.msk.f32.mxu1 %vm1806_vm0, %v1805_v0 }
  0xb4   : > { %1690 = vmatmul.mubr.msk.f32.vlgmr.msra.gmra.mrb[0].mxu0 %vm364_vm2, %v1550_v47 }
  0xb5   : > { %1692 = vmatprep.mubr.msk.f32.mxu0 %vm1806_vm0, %v1805_v0 }
  0xb6   : > { %1635 = vmatmul.mubr.msk.f32.vlgmr.msra.gmra.mrb[0].mxu1 %vm364_vm2, %v1515_v48 }
  0xb7   : > { %1637 = vmatprep.mubr.msk.f32.mxu1 %vm1806_vm0, %v1805_v0  ;;  %1699 = vmatpush3.msk.msra.mxu1 %vm374_vm1, %v1902_v2 }
  0xb8   : > { %1693 = vmatmul.mubr.msk.f32.gmra.mrb[2].mxu0 %vm364_vm2, %v1551_v49 }
  0xb9   : > { %1695 = vmatprep.mubr.msk.f32.mxu0 %vm1806_vm0, %v1805_v0 }
  0xba   : > { %1638 = vmatmul.mubr.msk.f32.gmra.mrb[2].mxu1 %vm364_vm2, %v1516_v50 }
  0xbb   : > { %1640 = vmatprep.mubr.msk.f32.mxu1 %vm1806_vm0, %v1805_v0 }
  0xbc   : > { %1696 = vmatmul.mubr.msk.f32.gmra.mrb[4].mxu0 %vm364_vm2, %v1552_v51 }
  0xbe   : > { %1641 = vmatmul.mubr.msk.f32.gmra.mrb[4].mxu1 %vm364_vm2, %v1517_v52 }
  0xbf   : > { %1648 = vmatprep.mubr.msk.f32.mxu1 %vm1806_vm0, %v1805_v0 }
  0xc2   : > { %1649 = vmatmul.mubr.msk.f32.vlgmr.msra.gmra.mrb[2].mxu1 %vm364_vm2, %v1523_v53 }
  0xc3   : > { %1651 = vmatprep.mubr.msk.f32.mxu1 %vm1806_vm0, %v1805_v0 }
  0xc6   : > { %1652 = vmatmul.mubr.msk.f32.gmra.mrb[4].mxu1 %vm364_vm2, %v1524_v54 }
 0x187   : > { %v1260_v55 = vpop.f32.mrb[0].mxu0 }
 0x188   : > { %v1691_v56 = vpop.f32.mrb[1].mxu0 }
 0x189   : > { %v745_v57 = vpop.f32.mrb[0].mxu1 }
 0x18a   : > { %v1700_v59 = vadd.f32 %v1260_v55, %v745_v57  ;;  %v1636_v60 = vpop.f32.mrb[1].mxu1 }
 0x18b   : > { %v1265_v61 = vpop.f32.mrb[2].mxu0 }
 0x18c   : > { %v1694_v62 = vpop.f32.mrb[3].mxu0  ;;  %1277 = vst [vmem:[%s2104_s26] sm:$0xff] %v1700_v59  ;;  %v1287_v63 = vmul.f32 %v1700_v59, %v1557_v58 }
 0x18e   : > { %1290 = vadd.xlane.f32.xlu0 %v1287_v63  ;;  %v1299_v2 = vmul.f32 %v1700_v59, %v1287_v63 }
 0x18f   : > { %v1270_v0 = vpop.f32.mrb[4].mxu0 }
 0x190   : > { %v1697_v1 = vpop.f32.mrb[5].mxu0 }
 0x192   : > { %1302 = vadd.xlane.f32.xlu0 %v1299_v2 }
 0x193   : > { %v1357_v19 = vld [vmem:[%s2104_s26] sm:$0xff] (%p1875_p4) }
 0x194   : > { %1358 = vst [vmem:[%s1325_s12] sm:$0xff] (%p1875_p4), %v1357_v19 }
 0x195   : > { %v848_v3 = vpop.f32.mrb[2].mxu1 }
 0x196   : > { %v1701_v4 = vadd.f32 %v1265_v61, %v848_v3  ;;  %v1650_v5 = vpop.f32.mrb[3].mxu1 }
 0x198   : > { %1278 = vst [vmem:[%s2104_s26 + $0x8] sm:$0xff] %v1701_v4  ;;  %v1288_v6 = vmul.f32 %v1701_v4, %v1557_v58 }
 0x199   : > { %v853_v7 = vpop.f32.mrb[4].mxu1 }
 0x19a   : > { %v1702_v8 = vadd.f32 %v1270_v0, %v853_v7  ;;  %v1653_v9 = vpop.f32.mrb[5].mxu1  ;;  %1292 = vadd.xlane.f32.xlu1 %v1288_v6  ;;  %v1300_v10 = vmul.f32 %v1701_v4, %v1288_v6 }
 0x19c   : > { %1279 = vst [vmem:[%s2104_s26 + $0x10] sm:$0xff] %v1702_v8  ;;  %v1289_v11 = vmul.f32 %v1702_v8, %v1557_v58 }
 0x19e   : > { %1304 = vadd.xlane.f32.xlu1 %v1300_v10  ;;  %1294 = vadd.xlane.f32.xlu0 %v1289_v11  ;;  %v1301_v12 = vmul.f32 %v1702_v8, %v1289_v11 }
 0x19f   : > { %v1359_v20 = vld [vmem:[%s2104_s26 + $0x8] sm:$0xff] (%p1875_p4) }
 0x1a0   : > { %1360 = vst [vmem:[%s1325_s12 + $0x30] sm:$0xff] (%p1875_p4), %v1359_v20 }
 0x1a2   : > { %1306 = vadd.xlane.f32.xlu0 %v1301_v12 }
 0x1a3   : > { %v1361_v21 = vld [vmem:[%s2104_s26 + $0x10] sm:$0xff] (%p1875_p4) }
 0x1a4   : > { %1362 = vst [vmem:[%s1325_s12 + $0x60] sm:$0xff] (%p1875_p4), %v1361_v21 }
 0x21b   : > { %v1291_v13 = vpop.xlane.xlu0 %1290 }
 0x21c   : > { %1296 = vst.msk [vmem:[%s345_s30] sm:$0xff] %vm666_vm10, %v1291_v13 }
 0x21f   : > { %v1303_v14 = vpop.xlane.xlu0 %1302 }
 0x220   : > { %1309 = vst.msk [vmem:[%s345_s30] sm:$0xff] %vm1308_vm11, %v1303_v14 }
 0x227   : > { %v1293_v15 = vpop.xlane.xlu1 %1292 }
 0x228   : > { %1297 = vst.msk [vmem:[%s345_s30 + $0x8] sm:$0xff] %vm666_vm10, %v1293_v15 }
 0x22a   : > { %1323 = sbr.rel (!%p1875_p4) target bundleno = 561 (0x231), region = 44 }
 0x22b   : > { %v1305_v16 = vpop.xlane.xlu1 %1304  ;;  %v1295_v17 = vpop.xlane.xlu0 %1294 }
 0x22c   : > { %1310 = vst.msk [vmem:[%s345_s30 + $0x8] sm:$0xff] %vm1308_vm11, %v1305_v16 }
 0x22d   : > { %1298 = vst.msk [vmem:[%s345_s30 + $0x10] sm:$0xff] %vm666_vm10, %v1295_v17 }
 0x22f   : > { %v1307_v18 = vpop.xlane.xlu0 %1306 }
 0x230   : > { %1311 = vst.msk [vmem:[%s345_s30 + $0x10] sm:$0xff] %vm1308_vm11, %v1307_v18 }
 0x231 PF: > { %p14_p11 = scmp.ge.s32.totalorder %s1865_s25, 8   ;;  %s2144_s21 = smov %s1799_s22 }
 0x232   : > { %s2145_s22 = smov %s1873_s28  ;;  %s2146_s23 = smov %s1865_s25 }
 0x233   :  { %16 = sbr.rel (!%p14_p11) target bundleno = 2 (0x2), region = 137 }

</bundles_post_ra>
